<compile_context>
chip_gen: v6e
topology: v6e:2x2x1
jax: 0.10.0
libtpu: 0.0.40
codegen_flags: <defaults>
</compile_context>

<pallas_src>
import functools

import jax
import jax.numpy as jnp
from jax.experimental import pallas as pl
from jax.experimental.pallas import tpu as pltpu


# ----------------------------------------------------------------------------- kernel
def _mlp_kernel(x_ref, w1t_ref, w3t_ref, w2t_ref, o_ref, *scratch, use_acc):
    """One (token-tile i, inter-chunk j) step of the fused SwiGLU MLP.

    x_ref   : (tm, dim)   activation tile (resident across inter chunks)
    w1t_ref : (dim, tn)   K-major chunk of W1^T (pre-transposed at load time)
    w3t_ref : (dim, tn)   K-major chunk of W3^T
    w2t_ref : (tn, dim)   K-major chunk of W2^T
    o_ref   : (tm, dim)   output tile (resident across inter chunks)
    scratch : optional (tm, dim) f32 accumulator; omitted when the output is f32
              and can be accumulated into directly.
    """
    j = pl.program_id(1)
    acc_ref = scratch[0] if use_acc else o_ref

    @pl.when(j == 0)
    def _():
        acc_ref[...] = jnp.zeros_like(acc_ref)

    x = x_ref[...]
    # Canonical (M,K)x(K,N) contractions -- weights are already K-major, so no
    # per-chunk transposes are generated.
    h1 = jnp.dot(x, w1t_ref[...], preferred_element_type=jnp.float32)
    h3 = jnp.dot(x, w3t_ref[...], preferred_element_type=jnp.float32)

    # SiLU gate in f32; the sigmoid issues on the EUP slot (hidden next to MXU work).
    gated = (h1 * jax.nn.sigmoid(h1)) * h3                        # (tm, tn) f32

    # Partial down-projection for this inter chunk, accumulated in f32.
    acc_ref[...] += jnp.dot(gated.astype(w2t_ref.dtype), w2t_ref[...],
                            preferred_element_type=jnp.float32)

    if use_acc:
        @pl.when(j == pl.num_programs(1) - 1)
        def _():
            o_ref[...] = acc_ref[...].astype(o_ref.dtype)


# ----------------------------------------------------------------------------- weight prep (one-time, outside jit)
def prepare_mlp_weights(w1, w2, w3, compute_dtype=None):
    """One-time weight preparation -- call at load time, NOT per forward call.

    w1, w3 : (inter_dim, dim)  nn.Linear layout (out_features, in_features), no bias
    w2     : (dim, inter_dim)

    Returns (w1t, w2t, w3t):
      w1t, w3t : (dim, inter_p)  K-major
      w2t      : (inter_p, dim)  K-major
    with inter_p = inter_dim rounded up to a multiple of 128 (zero padding is
    numerically inert: SiLU(0) * 0 = 0).  The optional dtype cast (e.g. bf16 for
    the MXU) happens here exactly once so the kernel never pays per-call HBM
    traffic for weight conversion.
    """
    if compute_dtype is not None:
        w1 = w1.astype(compute_dtype)
        w2 = w2.astype(compute_dtype)
        w3 = w3.astype(compute_dtype)
    inter_dim = w1.shape[0]
    pad = (-inter_dim) % 128
    if pad:
        w1 = jnp.pad(w1, ((0, pad), (0, 0)))
        w3 = jnp.pad(w3, ((0, pad), (0, 0)))
        w2 = jnp.pad(w2, ((0, 0), (0, pad)))
    # Eager (outside jit) -> materialized exactly once in HBM.
    return w1.T, w2.T, w3.T


# ----------------------------------------------------------------------------- tiling helpers
def _round_up(x, n):
    return ((x + n - 1) // n) * n


def _tn_candidates(inter_p, tn_target):
    """128-multiple divisors of inter_p, descending, starting <= tn_target."""
    start = max(128, min((tn_target // 128) * 128, inter_p))
    cands = [t for t in range(start, 127, -128) if inter_p % t == 0]
    return cands or [inter_p]


def _shrink_tm(tm):
    if tm > 256:
        return max(128, (tm // 2 // 128) * 128)
    if tm > 128:
        return 128
    if tm > 8:
        return max(8, (tm // 2 // 8) * 8)
    return tm


def _vmem_needed(tm, tn, dim, x_item, w_item, o_item, use_acc, wbuf):
    need = wbuf * 2 * dim * tn * w_item       # W1^T + W3^T chunks (multi-buffered)
    need += wbuf * tn * dim * w_item          # W2^T chunk
    need += 2 * tm * dim * x_item             # x tile (double-buffered)
    need += 2 * tm * dim * o_item             # output tile
    if use_acc:
        need += tm * dim * 4                  # f32 accumulator scratch
    need += 3 * tm * tn * 4                   # h1 / h3 / gated f32 temporaries
    return need


# ----------------------------------------------------------------------------- forward
@functools.partial(jax.jit, static_argnames=("tm_target", "tn_target"))
def mlp_forward(x, w1t, w2t, w3t, *, tm_target=512, tn_target=512):
    """SwiGLU MLP forward.

    x          : (..., dim)
    w1t, w3t   : (dim, inter_p)  from prepare_mlp_weights
    w2t        : (inter_p, dim)
    Matmuls run in the weight dtype (e.g. bf16) with f32 accumulation; the output
    keeps x.dtype.
    """
    orig_shape = x.shape
    dim = orig_shape[-1]
    out_dtype = x.dtype
    compute_dtype = w1t.dtype

    # Defensive: pad inter to a 128-multiple if the caller skipped prepare_mlp_weights.
    inter_p = w1t.shape[1]
    rem = (-inter_p) % 128
    if rem:
        w1t = jnp.pad(w1t, ((0, 0), (0, rem)))
        w3t = jnp.pad(w3t, ((0, 0), (0, rem)))
        w2t = jnp.pad(w2t, ((0, rem), (0, 0)))
        inter_p += rem

    x2d = x.reshape(-1, dim).astype(compute_dtype)
    m = x2d.shape[0]

    use_acc = jnp.dtype(out_dtype) != jnp.dtype(jnp.float32)

    x_item = jnp.dtype(compute_dtype).itemsize
    w_item = jnp.dtype(compute_dtype).itemsize
    o_item = jnp.dtype(out_dtype).itemsize

    # --- per-core VMEM budget (leave headroom for Mosaic internal scratch) ---
    try:
        vmem_cap = int(getattr(pltpu.get_tpu_info(), "vmem_capacity_bytes", 0)) or (64 << 20)
    except Exception:
        vmem_cap = 64 << 20        # v7x-safe conservative fallback
    budget = int(vmem_cap * 0.85)  # ~54 MiB on v7x, ~109 MiB on v5e/v6e

    # --- token tile (128-aligned for MXU fill when multi-tile) ---------------
    if m <= tm_target:
        tm = _round_up(m, 8)       # single resident tile (decode / small batch)
    else:
        align = 128 if tm_target >= 128 else 8
        tm = max(align, (tm_target // align) * align)

    # --- inter-dim streaming chunk, shrunk (then tm) to fit the VMEM budget --
    cands = _tn_candidates(inter_p, tn_target)
    idx = 0
    while True:
        tn = cands[idx]
        gm = -(-m // tm)
        wbuf = 3 if (gm == 1 and inter_p // tn >= 3) else 2
        need = _vmem_needed(tm, tn, dim, x_item, w_item, o_item, use_acc, wbuf)
        if need <= budget:
            break
        if idx + 1 < len(cands):
            idx += 1
            continue
        new_tm = _shrink_tm(tm)
        if new_tm < tm:
            tm = new_tm
            continue
        break                      # best effort

    if m % tm:
        x2d = jnp.pad(x2d, ((0, (-m) % tm), (0, 0)))  # zero rows contribute nothing
    m_pad = x2d.shape[0]
    grid = (m_pad // tm, inter_p // tn)               # reduction (inter) axis last
    wbuf = 3 if (grid[0] == 1 and grid[1] >= 3) else 2

    vmem_limit = max(32 << 20, min(budget, max(64 << 20, int(need * 1.4))))

    def wspec(shape, imap):
        if wbuf > 2:               # deeper weight buffering for decode / small batch
            return pl.BlockSpec(shape, imap, pipeline_mode=pl.Buffered(wbuf))
        return pl.BlockSpec(shape, imap)

    cost = pl.CostEstimate(
        flops=6 * m_pad * dim * inter_p,
        transcendentals=m_pad * inter_p,
        bytes_accessed=int(x2d.size * x_item
                           + grid[0] * (w1t.size + w3t.size + w2t.size) * w_item
                           + m_pad * dim * o_item),
    )

    out2d = pl.pallas_call(
        functools.partial(_mlp_kernel, use_acc=use_acc),
        out_shape=jax.ShapeDtypeStruct((m_pad, dim), out_dtype),
        grid_spec=pltpu.PrefetchScalarGridSpec(
            num_scalar_prefetch=0,
            grid=grid,
            in_specs=[
                pl.BlockSpec((tm, dim), lambda i, j: (i, 0)),   # x tile (resident over j)
                wspec((dim, tn), lambda i, j: (0, j)),          # W1^T chunk
                wspec((dim, tn), lambda i, j: (0, j)),          # W3^T chunk
                wspec((tn, dim), lambda i, j: (j, 0)),          # W2^T chunk
            ],
            out_specs=pl.BlockSpec((tm, dim), lambda i, j: (i, 0)),
            scratch_shapes=([pltpu.VMEM((tm, dim), jnp.float32)] if use_acc else []),
        ),
        compiler_params=pltpu.CompilerParams(
            dimension_semantics=("parallel", "arbitrary"),
            vmem_limit_bytes=vmem_limit,
        ),
        cost_estimate=cost,
    )(x2d, w1t, w3t, w2t)

    if m_pad != m:
        out2d = out2d[:m]
    return out2d.reshape(orig_shape)


# ----------------------------------------------------------------------------- reference & tests
def _reference(x, w1, w2, w3):
    h1 = x @ w1.T
    h3 = x @ w3.T
    return (jax.nn.silu(h1) * h3) @ w2.T


if __name__ == "__main__":
    key = jax.random.PRNGKey(0)
    kx, k1, k2, k3, kd, k1b, k2b, k3b = jax.random.split(key, 8)

    batch, seq, dim, inter_dim = 2, 64, 128, 512

    x = jax.random.normal(kx, (batch, seq, dim), dtype=jnp.float32)
    # nn.Linear weight convention: (out_features, in_features), no bias
    w1 = jax.random.normal(k1, (inter_dim, dim), dtype=jnp.float32) * (dim ** -0.5)
    w2 = jax.random.normal(k2, (dim, inter_dim), dtype=jnp.float32) * (inter_dim ** -0.5)
    w3 = jax.random.normal(k3, (inter_dim, dim), dtype=jnp.float32) * (dim ** -0.5)

    # ---- 1) f32 prefill path: 2 token tiles x 2 inter chunks, direct-output accumulation
    w1t, w2t, w3t = prepare_mlp_weights(w1, w2, w3)               # one-time prep
    out = mlp_forward(x, w1t, w2t, w3t, tm_target=64, tn_target=256)
    jax.block_until_ready(out)
    ref = _reference(x, w1, w2, w3)
    assert out.shape == (batch, seq, dim)
    assert jnp.allclose(out, ref, atol=1e-4, rtol=1e-4)

    # ---- 2) decode-style path: single token tile, Buffered(3) weight streaming, token padding
    x_dec = jax.random.normal(kd, (1, 4, dim), dtype=jnp.float32)
    out_dec = mlp_forward(x_dec, w1t, w2t, w3t, tm_target=64, tn_target=128)
    jax.block_until_ready(out_dec)
    ref_dec = _reference(x_dec, w1, w2, w3)
    assert out_dec.shape == (1, 4, dim)
    assert jnp.allclose(out_dec, ref_dec, atol=1e-4, rtol=1e-4)

    # ---- 3) bf16 compute path: weights cast ONCE at prepare time, f32 accumulation scratch
    w1t_bf, w2t_bf, w3t_bf = prepare_mlp_weights(w1, w2, w3, compute_dtype=jnp.bfloat16)
    x_bf = x.astype(jnp.bfloat16)
    out_bf = mlp_forward(x_bf, w1t_bf, w2t_bf, w3t_bf)
    jax.block_until_ready(out_bf)
    assert out_bf.dtype == jnp.bfloat16 and out_bf.shape == (batch, seq, dim)
    assert jnp.allclose(out_bf.astype(jnp.float32), ref, atol=1e-1, rtol=5e-2)

    # ---- 4) non-128-multiple inter_dim: prepare pads it (no full-extent fallback)
    inter_odd = 200
    w1o = jax.random.normal(k1b, (inter_odd, dim), dtype=jnp.float32) * (dim ** -0.5)
    w2o = jax.random.normal(k2b, (dim, inter_odd), dtype=jnp.float32) * (inter_odd ** -0.5)
    w3o = jax.random.normal(k3b, (inter_odd, dim), dtype=jnp.float32) * (dim ** -0.5)
    w1ot, w2ot, w3ot = prepare_mlp_weights(w1o, w2o, w3o)
    x_small = x[:, :8, :]                                          # m = 16 tokens
    out_odd = mlp_forward(x_small, w1ot, w2ot, w3ot)
    jax.block_until_ready(out_odd)
    ref_odd = _reference(x_small, w1o, w2o, w3o)
    assert out_odd.shape == x_small.shape
    assert jnp.allclose(out_odd, ref_odd, atol=1e-4, rtol=1e-4)

    # TODO(synk): ColumnParallelLinear/RowParallelLinear tensor-parallel sharding is not
    # modeled; weights are treated as full (single-device) matrices.
    print("KERNEL_OK")
</pallas_src>

<mosaic_0001>
module attributes {stable_mosaic.version = 11 : i64} {
  func.func @_mlp_kernel(%arg0: i32, %arg1: i32, %arg2: memref<64x128xf32, #tpu.memory_space<vmem>>, %arg3: memref<128x256xf32, #tpu.memory_space<vmem>>, %arg4: memref<128x256xf32, #tpu.memory_space<vmem>>, %arg5: memref<256x128xf32, #tpu.memory_space<vmem>>, %arg6: memref<64x128xf32, #tpu.memory_space<vmem>>) attributes {dimension_semantics = [#tpu.dimension_semantics<parallel>, #tpu.dimension_semantics<arbitrary>], iteration_bounds = array<i64: 2, 2>, scalar_prefetch = 0 : i64, scratch_operands = 0 : i64, tpu.core_type = #tpu.core_type<tc>, window_params = [{transform_indices = @transform_0, window_bounds = array<i64: 64, 128>}, {transform_indices = @transform_1, window_bounds = array<i64: 128, 256>}, {transform_indices = @transform_2, window_bounds = array<i64: 128, 256>}, {transform_indices = @transform_3, window_bounds = array<i64: 256, 128>}, {transform_indices = @transform_4, window_bounds = array<i64: 64, 128>}]} {
    %c0_i32 = arith.constant 0 : i32
    %0 = arith.cmpi eq, %arg1, %c0_i32 : i32
    %1 = arith.extui %0 : i1 to i32
    %c0_i32_0 = arith.constant 0 : i32
    %2 = arith.cmpi ne, %1, %c0_i32_0 : i32
    scf.if %2 {
      %cst_15 = arith.constant 0.000000e+00 : f32
      %20 = vector.broadcast %cst_15 : f32 to vector<64x128xf32>
      %c0_16 = arith.constant 0 : index
      %c0_17 = arith.constant 0 : index
      %21 = vector.load %arg6[%c0_16, %c0_17] : memref<64x128xf32, #tpu.memory_space<vmem>>, vector<64x128xf32>
      tpu.vector_store %arg6[%c0_16, %c0_17], %20 {strides = array<i32>} : memref<64x128xf32, #tpu.memory_space<vmem>>, vector<64x128xf32>,
    } else {
    }
    %c0 = arith.constant 0 : index
    %c0_1 = arith.constant 0 : index
    %3 = vector.load %arg2[%c0, %c0_1] : memref<64x128xf32, #tpu.memory_space<vmem>>, vector<64x128xf32>
    %c0_2 = arith.constant 0 : index
    %c0_3 = arith.constant 0 : index
    %4 = vector.load %arg3[%c0_2, %c0_3] : memref<128x256xf32, #tpu.memory_space<vmem>>, vector<128x256xf32>
    %cst = arith.constant dense<0.000000e+00> : vector<64x256xf32>
    %5 = tpu.matmul %3, %4, %cst {dimension_numbers = #tpu.dot_dimension_numbers<[1], [0], [0], [1], [0, 0, 1, 1], [], []>} : vector<64x128xf32>, vector<128x256xf32>, vector<64x256xf32> -> vector<64x256xf32>
    %c0_4 = arith.constant 0 : index
    %c0_5 = arith.constant 0 : index
    %6 = vector.load %arg4[%c0_4, %c0_5] : memref<128x256xf32, #tpu.memory_space<vmem>>, vector<128x256xf32>
    %cst_6 = arith.constant dense<0.000000e+00> : vector<64x256xf32>
    %7 = tpu.matmul %3, %6, %cst_6 {dimension_numbers = #tpu.dot_dimension_numbers<[1], [0], [0], [1], [0, 0, 1, 1], [], []>} : vector<64x128xf32>, vector<128x256xf32>, vector<64x256xf32> -> vector<64x256xf32>
    %8 = arith.negf %5 : vector<64x256xf32>
    %9 = math.exp %8 : vector<64x256xf32>
    %cst_7 = arith.constant 1.000000e+00 : f32
    %10 = vector.broadcast %cst_7 : f32 to vector<64x256xf32>
    %11 = arith.addf %10, %9 : vector<64x256xf32>
    %12 = arith.divf %10, %11 : vector<64x256xf32>
    %13 = arith.mulf %5, %12 : vector<64x256xf32>
    %14 = arith.mulf %13, %7 : vector<64x256xf32>
    %c0_8 = arith.constant 0 : index
    %c0_9 = arith.constant 0 : index
    %15 = vector.load %arg6[%c0_8, %c0_9] : memref<64x128xf32, #tpu.memory_space<vmem>>, vector<64x128xf32>
    %c0_10 = arith.constant 0 : index
    %c0_11 = arith.constant 0 : index
    %16 = vector.load %arg5[%c0_10, %c0_11] : memref<256x128xf32, #tpu.memory_space<vmem>>, vector<256x128xf32>
    %cst_12 = arith.constant dense<0.000000e+00> : vector<64x128xf32>
    %17 = tpu.matmul %14, %16, %cst_12 {dimension_numbers = #tpu.dot_dimension_numbers<[1], [0], [0], [1], [0, 0, 1, 1], [], []>} : vector<64x256xf32>, vector<256x128xf32>, vector<64x128xf32> -> vector<64x128xf32>
    %18 = arith.addf %15, %17 : vector<64x128xf32>
    %c0_13 = arith.constant 0 : index
    %c0_14 = arith.constant 0 : index
    %19 = vector.load %arg6[%c0_13, %c0_14] : memref<64x128xf32, #tpu.memory_space<vmem>>, vector<64x128xf32>
    tpu.vector_store %arg6[%c0_13, %c0_14], %18 {strides = array<i32>} : memref<64x128xf32, #tpu.memory_space<vmem>>, vector<64x128xf32>,
    return
  }
  func.func @transform_0(%arg0: i32, %arg1: i32) -> (i32, i32) {
    %c0_i32 = arith.constant 0 : i32
    %c0_i32_0 = arith.constant 0 : i32
    return %arg0, %c0_i32 : i32, i32
  }
  func.func @transform_1(%arg0: i32, %arg1: i32) -> (i32, i32) {
    %c0_i32 = arith.constant 0 : i32
    %c0_i32_0 = arith.constant 0 : i32
    return %c0_i32, %arg1 : i32, i32
  }
  func.func @transform_2(%arg0: i32, %arg1: i32) -> (i32, i32) {
    %c0_i32 = arith.constant 0 : i32
    %c0_i32_0 = arith.constant 0 : i32
    return %c0_i32, %arg1 : i32, i32
  }
  func.func @transform_3(%arg0: i32, %arg1: i32) -> (i32, i32) {
    %c0_i32 = arith.constant 0 : i32
    %c0_i32_0 = arith.constant 0 : i32
    return %arg1, %c0_i32 : i32, i32
  }
  func.func @transform_4(%arg0: i32, %arg1: i32) -> (i32, i32) {
    %c0_i32 = arith.constant 0 : i32
    %c0_i32_0 = arith.constant 0 : i32
    return %arg0, %c0_i32 : i32, i32
  }
}

</mosaic_0001>

<bundles_post_ra>
// kernel: mlp_forward.1
= control target key start
LH: loop header
LB: loop body
LE: loop exit
PB: predicated region body
PF: predicated region fallthrough
CT: control target
= control target key end

     0   :  { %s2269_s0 = inlined_call_operand.hbm [shape: f32[128,128], index: 0, kind: input, shape index: {}]   ;;  %s2270_s1 = inlined_call_operand.hbm [shape: f32[128,512], index: 1, kind: input, shape index: {}]   ;;  %s2271_s2 = inlined_call_operand.hbm [shape: f32[128,512], index: 2, kind: input, shape index: {}]   ;;  %s2272_s3 = inlined_call_operand.hbm [shape: f32[512,128], index: 3, kind: input, shape index: {}]   ;;  %s2273_s4 = inlined_call_operand.hbm [shape: f32[128,128], index: 4, kind: output, shape index: {}]  }
   0x1   :  { %2291 = sst [smem:[#allocation25_spill]] %s2269_s0 }
   0x2   :  { %2292 = sst [smem:[#allocation26_spill]] %s2270_s1 }
   0x3   :  { %2293 = sst [smem:[#allocation27_spill]] %s2271_s2 }
   0x4   :  { %2294 = sst [smem:[#allocation28_spill]] %s2273_s4 }
   0x5   :  { %9 = vsyncpa [#allocation3], 0 }
   0x6   :  { %11 = vsyncpa [#allocation3 + $0x1], 0 }
   0x7   :  { %12 = vsyncpa [#allocation6], 0 }
   0x8   :  { %14 = vsyncpa [#allocation6 + $0x1], 0 }
   0x9   :  { %15 = vsyncpa [#allocation9], 0 }
   0xa   :  { %17 = vsyncpa [#allocation9 + $0x1], 0 }
   0xb   :  { %18 = vsyncpa [#allocation4], 0 }
   0xc   :  { %20 = vsyncpa [#allocation4 + $0x1], 0  ;;  %s1721_s15 = smov 0   ;;  %s1723_s16 = smov 0  }
   0xd   :  { %s1725_s17 = smov 0   ;;  %s1727_s18 = smov 0  }
   0xe   :  { %s1729_s19 = smov 0   ;;  %s1731_s20 = smov 0  }
   0xf   :  { %s1733_s21 = smov 0   ;;  %s1735_s22 = smov 0  }
  0x10   :  { %s1737_s23 = smov 0   ;;  %s1739_s24 = smov 0  }
  0x11   :  { %s1741_s25 = smov 0  }
  0x12 LB: > { %2295 = sst [smem:[#allocation15_spill]] %s1660_s20  ;;  %s35_s26 = sadd.s32 1, %s1672_s23  ;;  %s1680_s25 = sphi %s1741_s25, %s26_s25   ;;  %s1676_s24 = sphi %s1739_s24, %s2338_s24   ;;  %s1672_s23 = sphi %s1737_s23, %s2337_s23   ;;  %s1668_s22 = sphi %s1735_s22, %s2336_s22   ;;  %s1664_s21 = sphi %s1733_s21, %s2335_s21   ;;  %s1660_s20 = sphi %s1731_s20, %s2334_s20   ;;  %s1656_s19 = sphi %s1729_s19, %s2343_s19   ;;  %s1652_s18 = sphi %s1727_s18, %s2342_s18   ;;  %s1648_s17 = sphi %s1725_s17, %s2341_s17   ;;  %s1644_s16 = sphi %s1723_s16, %s2340_s16   ;;  %s1640_s15 = sphi %s1721_s15, %s2339_s15  }
  0x13   : > { %2296 = sst [smem:[#allocation16_spill]] %s1664_s21  ;;  %p53_p0 = scmp.eq.s32.totalorder %s1680_s25, 0 }
  0x14   : > { %2297 = sst [smem:[#allocation17_spill]] %s1668_s22  ;;  %p1778_p1 = scmp.ge.s32.totalorder %s35_s26, 2 }
  0x15   : > { %2298 = sst [smem:[#allocation18_spill]] %s1672_s23  ;;  %s71_s28 = sadd.s32 1, %s1648_s17 }
  0x16   : > { %2299 = sst [smem:[#allocation19_spill]] %s1676_s24  ;;  %p78_p2 = scmp.ne.s32.totalorder %s1648_s17, %s1644_s16 }
  0x17   : > { %p84_p3 = scmp.ne.s32.totalorder %s1644_s16, %s1640_s15  ;;  %s2345_s26 = smov (%p1778_p1, %s35_s26), 0 }
  0x18   : > { %2301 = sst [smem:[#allocation20_spill]] %s2345_s26  ;;  %p80_p4 = por %p78_p2, %p53_p0 }
  0x19   : > { %s68_s29 = ssub.s32 %s1672_s23, %s2345_s26  ;;  %p2278_p5 = scmp.lt.s32.totalorder %s1680_s25, 4 }
  0x1a   : > { %p69_p6 = scmp.eq.s32.totalorder %s68_s29, 0  ;;  %s207_s30 = sand.u32 1, %s1680_s25  }
  0x1b   : > { %s2274_s5 = sand.u32 1, %s1648_s17   ;;  %s1158_s8 = sshll.u32 %s1672_s23, 8 }
  0x1c   : > { %s1799_s6 = scalar_select %p69_p6, %s1648_s17, %s71_s28  }
  0x1d   : > { %s1803_s7 = sshll.u32 %s2274_s5, 8  ;;  %s2303_s1 = sld [smem:[#allocation26_spill]] }
  0x1e   : > { %2302 = sst [smem:[#allocation21_spill]] %s1799_s6  ;;  %s211_s12 = scalar_lea.vmem [#allocation5], %s1803_s7 }
  0x1f   : > { %s218_s13 = sshll.u32 %s211_s12, 4  ;;  %p1812_p7 = pnand %p2278_p5, %p80_p4  ;;  %s219_s13 = int_to_ptr.vmem [resolvable:$true] %s218_s13 }
  0x20   : > { %s2305_s2 = sld [smem:[#allocation27_spill]]  ;;  %s1821_s26 = scalar_lea.sflag [#allocation6], %s207_s30 }
  0x21   : > { %p2277_p8 = pneg %p1812_p7  ;;  %s1453_s9 = scalar_lea.vmem %s219_s13, 4096 }
  0x22   : > { %p1454_p9 = scmp.ne.s32.totalorder %s219_s13, %s1453_s9  ;;  %s1682_s10 = smov [#allocation5]  }
  0x23   : > { %s217_s11 = scalar_lea.hbm %s2303_s1, %s1158_s8  ;;  %s1458_s12 = sshll.u32 %s1682_s10, 4  ;;  %s1459_s12 = int_to_ptr.vmem [resolvable:$false] %s1458_s12 }
  0x24   : > { %p1456_p10 = pnand %p1454_p9, %p2277_p8  ;;  %s1460_s1 = scalar_lea.vmem %s1459_s12, 8192 }
  0x25   : > { %p1461_p12 = scmp.lt.s32.totalorder %s219_s13, %s1459_s12  ;;  %p1462_p13 = scmp.lt.s32.totalorder %s1460_s1, %s1453_s9 }
  0x26   : > { %s1819_s5 = scalar_lea.hbm %s2305_s2, %s1158_s8  ;;  %p1457_p11 = pneg %p1456_p10 }
  0x27   : > { %p1463_p2 = por %p1462_p13, %p1461_p12 }
  0x29   : > { %p1464_p4 = pnand %p1463_p2, %p1457_p11 }
  0x2b   : > { %1467 = shalt.err (!%p1464_p4)
}
  0x2c   : > { %s2276_s8 = smov 512   ;;  %s2279_s1 = smov 256  }
  0x2d   : > { %s2280_s30 = smov 16   ;;  %p1129_p6 = scmp.ge.s32.totalorder %s1680_s25, 1 }
  0x2e   : > { %1266 = dma.hbm_to_vmem [thread:$0]  (!%p1812_p7), %s217_s11, 4096, %s219_s13, %s1821_s26, %s2276_s8, %s2279_s1, %s2280_s30  }
  0x2f   : > { %p268_p9 = scmp.lt.s32.totalorder %s1680_s25, 5  ;;  %s1841_s29 = sadd.s32 4294967295, %s1680_s25  }
  0x30   : > { %s1114_s9 = sadd.s32 4294967294, %s1680_s25   ;;  %s38_s10 = sadd.s32 1, %s1676_s24 }
  0x31   : > { %p1836_p10 = pnand %p1129_p6, %p268_p9  ;;  %s2347_s10 = smov (!%p1778_p1, %s38_s10), %s1676_s24 }
  0x32   : > { %s45_s11 = sadd.s32 1, %s1660_s20  ;;  %p52_p11 = scmp.ne.s32.totalorder %s1660_s20, %s1656_s19 }
  0x33   : > { %p40_p12 = scmp.ge.s32.totalorder %s2347_s10, 2  ;;  %p58_p13 = scmp.ne.s32.totalorder %s1656_s19, %s1652_s18 }
  0x34   : > { %p1855_p2 = por %p53_p0, %p52_p11  ;;  %p59_p4 = scmp.eq.s32.totalorder %s1841_s29, 0 }
  0x35   : > { %s2349_s10 = smov (%p40_p12, %s2347_s10), 0  ;;  %p160_p0 = scmp.eq.s32.totalorder %s1841_s29, 3 }
  0x36   : > { %2308 = sst [smem:[#allocation22_spill]] %s2349_s10  ;;  %p1865_p1 = por %p59_p4, %p58_p13 }
  0x37   : > { %p1872_p6 = por %p84_p3, %p59_p4  ;;  %s42_s8 = ssub.s32 %s1676_s24, %s2349_s10 }
  0x38   : > { %p43_p9 = scmp.eq.s32.totalorder %s42_s8, 0  ;;  %p166_p8 = scmp.eq.s32.totalorder %s1114_s9, 3 }
  0x39   : > { %p1879_p5 = por %p160_p0, %p52_p11  ;;  %s186_s30 = sand.u32 1, %s1660_s20  }
  0x3a   : > { %s1885_s2 = scalar_select %p43_p9, %s1660_s20, %s45_s11  }
  0x3b   : > { %s2311_s1 = scalar_select %p1879_p5, 1, 0 }
  0x3c   : > { %2313 = sst [smem:[#allocation24_spill]] %s1885_s2  ;;  %p1890_p12 = por %p166_p8, %p58_p13 }
  0x3d   : > { %2312 = sst [smem:[#allocation23_spill]] %s2311_s1  ;;  %s1117_s15 = sshll.u32 %s186_s30, 6 }
  0x3e   : > { %s2314_s6 = scalar_select %p1890_p12, 1, 0 }
  0x3f   : > { %s1157_s4 = sshll.u32 %s1676_s24, 10  ;;  %s2315_s0 = sld [smem:[#allocation25_spill]] }
  0x40   : > { %s190_s8 = scalar_lea.vmem [#allocation2], %s1117_s15  ;;  %p2316_p3 = scmp.lt.s32.totalorder %s1680_s25, 4 }
  0x41   : > { %s197_s9 = sshll.u32 %s190_s8, 4  ;;  %s187_s11 = scalar_lea.sflag [#allocation3], %s186_s30  ;;  %s198_s9 = int_to_ptr.vmem [resolvable:$true] %s197_s9 }
  0x42   : > { %p1902_p11 = pnand %p2316_p3, %p1855_p2  ;;  %s1481_s2 = scalar_lea.vmem %s198_s9, 1024 }
  0x43   : > { %p1482_p13 = scmp.ne.s32.totalorder %s198_s9, %s1481_s2  ;;  %s1686_s24 = smov [#allocation2]  }
  0x44   : > { %p1470_p8 = pneg %p1902_p11  ;;  %s1486_s21 = sshll.u32 %s1686_s24, 4  ;;  %s1487_s21 = int_to_ptr.vmem [resolvable:$false] %s1486_s21 }
  0x45   : > { %s196_s10 = scalar_lea.hbm %s2315_s0, %s1157_s4  ;;  %s1488_s4 = scalar_lea.vmem %s1487_s21, 2048 }
  0x46   : > { %p1484_p4 = pnand %p1482_p13, %p1470_p8  ;;  %p1489_p9 = scmp.lt.s32.totalorder %s198_s9, %s1487_s21 }
  0x47   : > { %p1490_p12 = scmp.lt.s32.totalorder %s1488_s4, %s1481_s2 }
  0x48   : > { %p1485_p0 = pneg %p1484_p4 }
  0x49   : > { %p1491_p5 = por %p1490_p12, %p1489_p9 }
  0x4b   : > { %p1492_p2 = pnand %p1491_p5, %p1485_p0 }
  0x4d   : > { %1495 = shalt.err (!%p1492_p2)
}
  0x4e   : > { %s2287_s22 = smov 128   ;;  %s2288_s30 = smov 8  }
  0x4f   : > { %1263 = dma.hbm_to_vmem [thread:$0]  (!%p1902_p11), %s196_s10, 1024, %s198_s9, %s187_s11, %s2287_s22, %s2287_s22, %s2288_s30  }
  0x50   : > { %s232_s13 = scalar_lea.vmem [#allocation7], %s1803_s7  ;;  %s1160_s15 = sshll.u32 %s1672_s23, 12 }
  0x51   : > { %s239_s24 = sshll.u32 %s232_s13, 4  ;;  %p2318_p5 = pneg %p1812_p7  ;;  %s240_s24 = int_to_ptr.vmem [resolvable:$true] %s239_s24 }
  0x52   : > { %s1509_s8 = scalar_lea.vmem %s240_s24, 4096  ;;  %s1689_s2 = smov [#allocation7]  }
  0x53   : > { %p1510_p3 = scmp.ne.s32.totalorder %s240_s24, %s1509_s8  ;;  %s1514_s21 = sshll.u32 %s1689_s2, 4  ;;  %s1515_s21 = int_to_ptr.vmem [resolvable:$false] %s1514_s21 }
  0x54   : > { %s1516_s4 = scalar_lea.vmem %s1515_s21, 8192  ;;  %p1517_p13 = scmp.lt.s32.totalorder %s240_s24, %s1515_s21 }
  0x55   : > { %p1512_p12 = pnand %p1510_p3, %p2318_p5  ;;  %p1518_p4 = scmp.lt.s32.totalorder %s1516_s4, %s1509_s8 }
  0x57   : > { %p1513_p8 = pneg %p1512_p12  ;;  %p1519_p0 = por %p1518_p4, %p1517_p13 }
  0x59   : > { %p1520_p9 = pnand %p1519_p0, %p1513_p8 }
  0x5b   : > { %1523 = shalt.err (!%p1520_p9)
}
  0x5c   : > { %s2319_s1 = smov 16   ;;  %s2320_s10 = smov 256  }
  0x5d   : > { %s2321_s9 = smov 512   ;;  %s259_s2 = scalar_lea.hbm %s2272_s3, %s1160_s15 }
  0x5e   : > { %1269 = dma.hbm_to_vmem [thread:$0]  (!%p1812_p7), %s1819_s5, 4096, %s240_s24, %s1821_s26, %s2321_s9, %s2320_s10, %s2319_s1  }
  0x5f   : > { %s253_s21 = scalar_lea.vmem [#allocation8], %s1803_s7  ;;  %s2322_s4 = sand.u32 1, %s1648_s17  }
  0x60   : > { %s260_s8 = sshll.u32 %s253_s21, 4  ;;  %s250_s22 = scalar_lea.sflag [#allocation9], %s2322_s4  ;;  %s261_s8 = int_to_ptr.vmem [resolvable:$true] %s260_s8 }
  0x61   : > { %s1537_s30 = scalar_lea.vmem %s261_s8, 4096  ;;  %p2323_p2 = pmov %p2318_p5 }
  0x62   : > { %p1538_p11 = scmp.ne.s32.totalorder %s261_s8, %s1537_s30  ;;  %s1690_s0 = smov [#allocation8]  }
  0x63   : > { %s1542_s23 = sshll.u32 %s1690_s0, 4  ;;  %s1543_s23 = int_to_ptr.vmem [resolvable:$false] %s1542_s23 }
  0x64   : > { %p1540_p3 = pnand %p1538_p11, %p2323_p2  ;;  %s1544_s20 = scalar_lea.vmem %s1543_s23, 8192 }
  0x65   : > { %p1545_p12 = scmp.lt.s32.totalorder %s261_s8, %s1543_s23  ;;  %p1546_p8 = scmp.lt.s32.totalorder %s1544_s20, %s1537_s30 }
  0x66   : > { %p1541_p5 = pneg %p1540_p3 }
  0x67   : > { %p1547_p13 = por %p1546_p8, %p1545_p12 }
  0x69   : > { %p1548_p4 = pnand %p1547_p13, %p1541_p5 }
  0x6b   : > { %1551 = shalt.err (!%p1548_p4)
}
  0x6c   : > { %s2324_s26 = smov 8   ;;  %s2325_s5 = smov 128  }
  0x6d   : > { %1272 = dma.hbm_to_vmem [thread:$0]  (!%p1812_p7), %s259_s2, 4096, %s261_s8, %s250_s22, %s2325_s5, %s2325_s5, %s2324_s26  }
  0x6e   : > { %272 = sbr.rel (%p1836_p10) target bundleno = 648 (0x288), region = 36  ;;  %s1942_s7 = sand.u32 (!%p1836_p10), 1, %s1656_s19  }
  0x6f   : > { %s1130_s0 = sshll.u32 (!%p1836_p10), %s1942_s7, 6  ;;  %s275_s20 = scalar_lea.sflag (!%p1836_p10), [#allocation3], %s1942_s7 }
  0x70   : > { %s1946_s23 = scalar_lea.vmem (!%p1836_p10), [#allocation2], %s1130_s0 }
  0x73   : > { %1623 = dma.done.wait (%p1865_p1), %s275_s20, 1024  }
  0x74   : > { %1625 = vsyncadd (%p1865_p1), %s275_s20, 4294966272  ;;  %s283_s14 = sand.u32 1, %s1841_s29   ;;  %s285_s28 = sand.u32 1, %s1644_s16  }
  0x75   : > { %s1131_s22 = sshll.u32 %s285_s28, 8  ;;  %s284_s30 = scalar_lea.sflag [#allocation6], %s283_s14 }
  0x76   : > { %s1954_s24 = scalar_lea.vmem [#allocation5], %s1131_s22 }
  0x77   : > { %1627 = dma.done.wait (%p1872_p6), %s284_s30, 8192  }
  0x78   : > { %1629 = vsyncadd (%p1872_p6), %s284_s30, 4294959104  ;;  %s1960_s15 = scalar_lea.vmem [#allocation7], %s1131_s22  ;;  %s302_s1 = scalar_lea.sflag [#allocation9], %s285_s28 }
  0x79   : > { %s1962_s27 = scalar_lea.vmem [#allocation8], %s1131_s22 }
  0x7a   : > { %1631 = dma.done.wait (%p1872_p6), %s302_s1, 4096  }
  0x7b   : > { %1633 = vsyncadd (%p1872_p6), %s302_s1, 4294963200  ;;  %s1968_s29 = scalar_lea.vmem [#allocation10], %s1130_s0  ;;  %s2326_s10 = sld [smem:[#allocation16_spill]] }
  0x81   : > { %p1135_p7 = scmp.ne.s32.totalorder %s2326_s10, 0 }
  0x83   : > { %353 = sbr.rel (%p1135_p7) target bundleno = 141 (0x8d), region = 56 }
  0x88   : > { %v1691_v0 = vmov 0.0  }
  0x89   : > { %354 = vst [vmem:[%s1968_s29] sm:$0xff] %v1691_v0  ;;  %355 = vst [vmem:[%s1968_s29 + $0x8] sm:$0xff] %v1691_v0 }
  0x8a   : > { %356 = vst [vmem:[%s1968_s29 + $0x10] sm:$0xff] %v1691_v0  ;;  %357 = vst [vmem:[%s1968_s29 + $0x18] sm:$0xff] %v1691_v0 }
  0x8b   : > { %358 = vst [vmem:[%s1968_s29 + $0x20] sm:$0xff] %v1691_v0  ;;  %359 = vst [vmem:[%s1968_s29 + $0x28] sm:$0xff] %v1691_v0 }
  0x8c   : > { %360 = vst [vmem:[%s1968_s29 + $0x30] sm:$0xff] %v1691_v0  ;;  %361 = vst [vmem:[%s1968_s29 + $0x38] sm:$0xff] %v1691_v0 }
  0x8d PF: > { %v401_v1 = vld [vmem:[%s1954_s24 + $0xf8] sm:$0xff]  ;;  %v400_v2 = vld [vmem:[%s1954_s24 + $0xf0] sm:$0xff]  ;;  %v399_v3 = vld [vmem:[%s1954_s24 + $0xe8] sm:$0xff]  ;;  %v1692_v5 = vmov 0.0   ;;  %s2327_s12 = sld [smem:[#allocation17_spill]]  ;;  %s963_s13 = sshll.u32 %s1968_s29, 4  ;;  %s2206_s13 = int_to_ptr.vmem [resolvable:$true] %s963_s13 }
  0x8e   : > { %402 = vmatprep.subr.mxu0 %v401_v1  ;;  %v398_v4 = vld [vmem:[%s1954_s24 + $0xe0] sm:$0xff]  ;;  %466 = vmatprep.mubr.f32.mxu0 %v1692_v5  ;;  %v397_v6 = vld [vmem:[%s1954_s24 + $0xd8] sm:$0xff]  ;;  %v396_v7 = vld [vmem:[%s1954_s24 + $0xd0] sm:$0xff]  ;;  %s2328_s9 = sld [smem:[#allocation23_spill]]  ;;  %s950_s26 = scalar_lea.sflag [#allocation4], %s1942_s7 }
  0x8f   : > { %403 = vmatpush1.msra.mxu0 %v400_v2  ;;  %611 = vmatprep.mubr.f32.mxu1 %v1692_v5  ;;  %v395_v8 = vld [vmem:[%s1954_s24 + $0xc8] sm:$0xff]  ;;  %v394_v9 = vld [vmem:[%s1954_s24 + $0xc0] sm:$0xff]  ;;  %v393_v10 = vld [vmem:[%s1954_s24 + $0xb8] sm:$0xff]  ;;  %s2329_s8 = sld [smem:[#allocation28_spill]]  ;;  %s1552_s5 = scalar_lea.vmem %s2206_s13, 1024 }
  0x90   : > { %404 = vmatprep.subr.mxu0 %v399_v3  ;;  %v392_v11 = vld [vmem:[%s1954_s24 + $0xb0] sm:$0xff]  ;;  %v391_v12 = vld [vmem:[%s1954_s24 + $0xa8] sm:$0xff]  ;;  %v390_v13 = vld [vmem:[%s1954_s24 + $0xa0] sm:$0xff]  ;;  %p1553_p10 = scmp.ne.s32.totalorder %s2206_s13, %s1552_s5  ;;  %s1693_s0 = smov [#allocation10]  }
  0x91   : > { %405 = vmatpush1.msra.mxu0 %v398_v4  ;;  %v389_v14 = vld [vmem:[%s1954_s24 + $0x98] sm:$0xff]  ;;  %v388_v15 = vld [vmem:[%s1954_s24 + $0x90] sm:$0xff]  ;;  %v544_v18 = vld [vmem:[%s1960_s15 + $0xe8] sm:$0xff]  ;;  %s1556_s20 = sshll.u32 %s1693_s0, 4  ;;  %s1557_s20 = int_to_ptr.vmem [resolvable:$false] %s1556_s20 }
  0x92   : > { %406 = vmatprep.subr.mxu0 %v397_v6  ;;  %v546_v16 = vld [vmem:[%s1960_s15 + $0xf8] sm:$0xff]  ;;  %v545_v17 = vld [vmem:[%s1960_s15 + $0xf0] sm:$0xff]  ;;  %v387_v19 = vld [vmem:[%s1954_s24 + $0x88] sm:$0xff]  ;;  %p1559_p9 = scmp.lt.s32.totalorder %s2206_s13, %s1557_s20 }
  0x93   : > { %407 = vmatpush1.msra.mxu0 %v396_v7  ;;  %547 = vmatprep.subr.mxu1 %v546_v16  ;;  %v543_v20 = vld [vmem:[%s1960_s15 + $0xe0] sm:$0xff]  ;;  %v542_v22 = vld [vmem:[%s1960_s15 + $0xd8] sm:$0xff]  ;;  %v541_v24 = vld [vmem:[%s1960_s15 + $0xd0] sm:$0xff]  ;;  %s1161_s11 = sshll.u32 %s2327_s12, 10 }
  0x94   : > { %408 = vmatprep.subr.mxu0 %v395_v8  ;;  %v386_v21 = vld [vmem:[%s1954_s24 + $0x80] sm:$0xff]  ;;  %548 = vmatpush1.msra.mxu1 %v545_v17  ;;  %v385_v23 = vld [vmem:[%s1954_s24 + $0x78] sm:$0xff]  ;;  %v384_v25 = vld [vmem:[%s1954_s24 + $0x70] sm:$0xff]  ;;  %p2330_p1 = scmp.ne.s32.totalorder %s2328_s9, 0 }
  0x95   : > { %409 = vmatpush1.msra.mxu0 %v394_v9  ;;  %549 = vmatprep.subr.mxu1 %v544_v18  ;;  %v540_v26 = vld [vmem:[%s1960_s15 + $0xc8] sm:$0xff]  ;;  %v539_v28 = vld [vmem:[%s1960_s15 + $0xc0] sm:$0xff]  ;;  %v538_v30 = vld [vmem:[%s1960_s15 + $0xb8] sm:$0xff]  ;;  %s2204_s4 = scalar_lea.hbm %s2329_s8, %s1161_s11 }
  0x96   : > { %410 = vmatprep.subr.mxu0 %v393_v10  ;;  %550 = vmatpush1.msra.mxu1 %v543_v20  ;;  %v383_v27 = vld [vmem:[%s1954_s24 + $0x68] sm:$0xff]  ;;  %v382_v29 = vld [vmem:[%s1954_s24 + $0x60] sm:$0xff]  ;;  %v381_v31 = vld [vmem:[%s1954_s24 + $0x58] sm:$0xff]  ;;  %p1554_p6 = pnand %p1553_p10, %p2330_p1 }
  0x97   : > { %411 = vmatpush1.msra.mxu0 %v392_v11  ;;  %551 = vmatprep.subr.mxu1 %v542_v22  ;;  %v537_v32 = vld [vmem:[%s1960_s15 + $0xb0] sm:$0xff]  ;;  %v536_v34 = vld [vmem:[%s1960_s15 + $0xa8] sm:$0xff]  ;;  %v535_v36 = vld [vmem:[%s1960_s15 + $0xa0] sm:$0xff] }
  0x98   : > { %412 = vmatprep.subr.mxu0 %v391_v12  ;;  %552 = vmatpush1.msra.mxu1 %v541_v24  ;;  %v380_v33 = vld [vmem:[%s1954_s24 + $0x50] sm:$0xff]  ;;  %v379_v35 = vld [vmem:[%s1954_s24 + $0x48] sm:$0xff]  ;;  %v378_v37 = vld [vmem:[%s1954_s24 + $0x40] sm:$0xff]  ;;  %p1555_p0 = pneg %p1554_p6 }
  0x99   : > { %413 = vmatpush1.msra.mxu0 %v390_v13  ;;  %553 = vmatprep.subr.mxu1 %v540_v26  ;;  %v534_v38 = vld [vmem:[%s1960_s15 + $0x98] sm:$0xff]  ;;  %v533_v40 = vld [vmem:[%s1960_s15 + $0x90] sm:$0xff]  ;;  %v532_v42 = vld [vmem:[%s1960_s15 + $0x88] sm:$0xff] }
  0x9a   : > { %414 = vmatprep.subr.mxu0 %v389_v14  ;;  %554 = vmatpush1.msra.mxu1 %v539_v28  ;;  %v377_v39 = vld [vmem:[%s1954_s24 + $0x38] sm:$0xff]  ;;  %v376_v41 = vld [vmem:[%s1954_s24 + $0x30] sm:$0xff]  ;;  %v375_v43 = vld [vmem:[%s1954_s24 + $0x28] sm:$0xff] }
  0x9b   : > { %415 = vmatpush1.msra.mxu0 %v388_v15  ;;  %555 = vmatprep.subr.mxu1 %v538_v30  ;;  %v531_v44 = vld [vmem:[%s1960_s15 + $0x80] sm:$0xff]  ;;  %v530_v46 = vld [vmem:[%s1960_s15 + $0x78] sm:$0xff]  ;;  %v529_v48 = vld [vmem:[%s1960_s15 + $0x70] sm:$0xff] }
  0x9c   : > { %416 = vmatprep.subr.mxu0 %v387_v19  ;;  %556 = vmatpush1.msra.mxu1 %v537_v32  ;;  %v374_v45 = vld [vmem:[%s1954_s24 + $0x20] sm:$0xff]  ;;  %v373_v47 = vld [vmem:[%s1954_s24 + $0x18] sm:$0xff]  ;;  %v372_v49 = vld [vmem:[%s1954_s24 + $0x10] sm:$0xff] }
  0x9d   : > { %417 = vmatpush1.msra.mxu0 %v386_v21  ;;  %557 = vmatprep.subr.mxu1 %v536_v34  ;;  %v528_v50 = vld [vmem:[%s1960_s15 + $0x68] sm:$0xff]  ;;  %v527_v52 = vld [vmem:[%s1960_s15 + $0x60] sm:$0xff]  ;;  %v526_v54 = vld [vmem:[%s1960_s15 + $0x58] sm:$0xff] }
  0x9e   : > { %418 = vmatprep.subr.mxu0 %v385_v23  ;;  %558 = vmatpush1.msra.mxu1 %v535_v36  ;;  %v371_v51 = vld [vmem:[%s1954_s24 + $0x8] sm:$0xff]  ;;  %v370_v53 = vld [vmem:[%s1954_s24] sm:$0xff]  ;;  %v525_v56 = vld [vmem:[%s1960_s15 + $0x50] sm:$0xff] }
  0x9f   : > { %419 = vmatpush1.msra.mxu0 %v384_v25  ;;  %559 = vmatprep.subr.mxu1 %v534_v38  ;;  %v362_v55 = vld [vmem:[%s1946_s23] sm:$0xff]  ;;  %v524_v57 = vld [vmem:[%s1960_s15 + $0x48] sm:$0xff]  ;;  %v522_v59 = vld [vmem:[%s1960_s15 + $0x38] sm:$0xff] }
  0xa0   : > { %420 = vmatprep.subr.mxu0 %v383_v27  ;;  %560 = vmatpush1.msra.mxu1 %v533_v40  ;;  %v523_v58 = vld [vmem:[%s1960_s15 + $0x40] sm:$0xff]  ;;  %v363_v60 = vld [vmem:[%s1946_s23 + $0x8] sm:$0xff]  ;;  %v521_v61 = vld [vmem:[%s1960_s15 + $0x30] sm:$0xff] }
  0xa1   : > { %421 = vmatpush1.msra.mxu0 %v382_v29  ;;  %561 = vmatprep.subr.mxu1 %v532_v42  ;;  %v520_v62 = vld [vmem:[%s1960_s15 + $0x28] sm:$0xff]  ;;  %v519_v63 = vld [vmem:[%s1960_s15 + $0x20] sm:$0xff]  ;;  %v518_v0 = vld [vmem:[%s1960_s15 + $0x18] sm:$0xff] }
  0xa2   : > { %422 = vmatprep.subr.mxu0 %v381_v31  ;;  %562 = vmatpush1.msra.mxu1 %v531_v44  ;;  %v364_v1 = vld [vmem:[%s1946_s23 + $0x10] sm:$0xff]  ;;  %v516_v3 = vld [vmem:[%s1960_s15 + $0x8] sm:$0xff]  ;;  %v515_v4 = vld [vmem:[%s1960_s15] sm:$0xff] }
  0xa3   : > { %423 = vmatpush1.msra.mxu0 %v380_v33  ;;  %563 = vmatprep.subr.mxu1 %v530_v46  ;;  %v517_v2 = vld [vmem:[%s1960_s15 + $0x10] sm:$0xff]  ;;  %v365_v6 = vld [vmem:[%s1946_s23 + $0x18] sm:$0xff]  ;;  %v366_v7 = vld [vmem:[%s1946_s23 + $0x20] sm:$0xff] }
  0xa4   : > { %424 = vmatprep.subr.mxu0 %v379_v35  ;;  %564 = vmatpush1.msra.mxu1 %v529_v48  ;;  %v367_v8 = vld [vmem:[%s1946_s23 + $0x28] sm:$0xff]  ;;  %v368_v9 = vld [vmem:[%s1946_s23 + $0x30] sm:$0xff]  ;;  %v369_v10 = vld [vmem:[%s1946_s23 + $0x38] sm:$0xff]  ;;  %s1558_s23 = scalar_lea.vmem %s1557_s20, 2048 }
  0xa5   : > { %425 = vmatpush1.msra.mxu0 %v378_v37  ;;  %565 = vmatprep.subr.mxu1 %v528_v50  ;;  %v827_v11 = vld [vmem:[%s1962_s27 + $0xf8] sm:$0xff]  ;;  %v826_v13 = vld [vmem:[%s1962_s27 + $0xf0] sm:$0xff]  ;;  %v825_v15 = vld [vmem:[%s1962_s27 + $0xe8] sm:$0xff]  ;;  %p1560_p11 = scmp.lt.s32.totalorder %s1558_s23, %s1552_s5 }
  0xa6   : > { %426 = vmatprep.subr.mxu0 %v377_v39  ;;  %566 = vmatpush1.msra.mxu1 %v527_v52  ;;  %v811_v12 = vld [vmem:[%s1962_s27 + $0x78] sm:$0xff]  ;;  %v810_v14 = vld [vmem:[%s1962_s27 + $0x70] sm:$0xff]  ;;  %v824_v16 = vld [vmem:[%s1962_s27 + $0xe0] sm:$0xff] }
  0xa7   : > { %427 = vmatpush1.msra.mxu0 %v376_v41  ;;  %567 = vmatprep.subr.mxu1 %v526_v54  ;;  %v808_v17 = vld [vmem:[%s1962_s27 + $0x60] sm:$0xff]  ;;  %v823_v18 = vld [vmem:[%s1962_s27 + $0xd8] sm:$0xff]  ;;  %v822_v20 = vld [vmem:[%s1962_s27 + $0xd0] sm:$0xff]  ;;  %p1561_p2 = por %p1560_p11, %p1559_p9 }
  0xa8   : > { %428 = vmatprep.subr.mxu0 %v375_v43  ;;  %568 = vmatpush1.msra.mxu1 %v525_v56  ;;  %v807_v19 = vld [vmem:[%s1962_s27 + $0x58] sm:$0xff]  ;;  %v806_v21 = vld [vmem:[%s1962_s27 + $0x50] sm:$0xff]  ;;  %v821_v22 = vld [vmem:[%s1962_s27 + $0xc8] sm:$0xff] }
  0xa9   : > { %429 = vmatpush1.msra.mxu0 %v374_v45  ;;  %569 = vmatprep.subr.mxu1 %v524_v57  ;;  %v805_v23 = vld [vmem:[%s1962_s27 + $0x48] sm:$0xff]  ;;  %v820_v24 = vld [vmem:[%s1962_s27 + $0xc0] sm:$0xff]  ;;  %v819_v26 = vld [vmem:[%s1962_s27 + $0xb8] sm:$0xff]  ;;  %p1562_p3 = pnand %p1561_p2, %p1555_p0 }
  0xaa   : > { %430 = vmatprep.subr.mxu0 %v373_v47  ;;  %570 = vmatpush1.msra.mxu1 %v523_v58  ;;  %v804_v25 = vld [vmem:[%s1962_s27 + $0x40] sm:$0xff]  ;;  %v803_v27 = vld [vmem:[%s1962_s27 + $0x38] sm:$0xff]  ;;  %v818_v28 = vld [vmem:[%s1962_s27 + $0xb0] sm:$0xff] }
  0xab   : > { %431 = vmatpush1.msra.mxu0 %v372_v49  ;;  %571 = vmatprep.subr.mxu1 %v522_v59  ;;  %v802_v29 = vld [vmem:[%s1962_s27 + $0x30] sm:$0xff]  ;;  %v817_v30 = vld [vmem:[%s1962_s27 + $0xa8] sm:$0xff]  ;;  %v816_v32 = vld [vmem:[%s1962_s27 + $0xa0] sm:$0xff] }
  0xac   : > { %432 = vmatprep.subr.mxu0 %v371_v51  ;;  %572 = vmatpush1.msra.mxu1 %v521_v61  ;;  %v801_v31 = vld [vmem:[%s1962_s27 + $0x28] sm:$0xff]  ;;  %v800_v33 = vld [vmem:[%s1962_s27 + $0x20] sm:$0xff]  ;;  %v815_v34 = vld [vmem:[%s1962_s27 + $0x98] sm:$0xff] }
  0xad   : > { %433 = vmatpush1.msra.mxu0 %v370_v53  ;;  %573 = vmatprep.subr.mxu1 %v520_v62  ;;  %v799_v35 = vld [vmem:[%s1962_s27 + $0x18] sm:$0xff]  ;;  %v814_v36 = vld [vmem:[%s1962_s27 + $0x90] sm:$0xff]  ;;  %v813_v38 = vld [vmem:[%s1962_s27 + $0x88] sm:$0xff] }
  0xae   : > { %467 = vmatmul.mubr.f32.vlgmr.msra.gmra.mxu0 %v362_v55  ;;  %574 = vmatpush1.msra.mxu1 %v519_v63  ;;  %v798_v37 = vld [vmem:[%s1962_s27 + $0x10] sm:$0xff]  ;;  %v797_v39 = vld [vmem:[%s1962_s27 + $0x8] sm:$0xff]  ;;  %v812_v40 = vld [vmem:[%s1962_s27 + $0x80] sm:$0xff] }
  0xaf   : > { %472 = vmatprep.mubr.f32.mxu0 %v1692_v5  ;;  %575 = vmatprep.subr.mxu1 %v518_v0  ;;  %v796_v41 = vld [vmem:[%s1962_s27] sm:$0xff] }
  0xb0   : > { %576 = vmatpush1.msra.mxu1 %v517_v2  ;;  %1162 = vmatprep.subr.mxu0 %v827_v11 }
  0xb1   : > { %577 = vmatprep.subr.mxu1 %v516_v3  ;;  %1163 = vmatpush3.msra.mxu0 %v811_v12 }
  0xb2   : > { %473 = vmatmul.mubr.f32.gmra.mxu0 %v363_v60  ;;  %578 = vmatpush1.msra.mxu1 %v515_v4 }
  0xb3   : > { %478 = vmatprep.mubr.f32.mxu0 %v1692_v5  ;;  %612 = vmatmul.mubr.f32.vlgmr.msra.gmra.mxu1 %v362_v55 }
  0xb4   : > { %617 = vmatprep.mubr.f32.mxu1 %v1692_v5  ;;  %1218 = vmatprep.subr.mxu1 %v827_v11 }
  0xb5   : > { %1234 = vmatpush3.msra.mxu1 %v811_v12  ;;  %1164 = vmatprep.subr.mxu0 %v826_v13 }
  0xb6   : > { %479 = vmatmul.mubr.f32.gmra.mxu0 %v364_v1  ;;  %1219 = vmatprep.subr.mxu1 %v826_v13 }
  0xb7   : > { %484 = vmatprep.mubr.f32.mxu0 %v1692_v5  ;;  %618 = vmatmul.mubr.f32.gmra.mxu1 %v363_v60 }
  0xb8   : > { %623 = vmatprep.mubr.f32.mxu1 %v1692_v5  ;;  %1165 = vmatpush3.msra.mxu0 %v810_v14 }
  0xb9   : > { %1235 = vmatpush3.msra.mxu1 %v810_v14  ;;  %1166 = vmatprep.subr.mxu0 %v825_v15 }
  0xba   : > { %485 = vmatmul.mubr.f32.gmra.mxu0 %v365_v6  ;;  %1220 = vmatprep.subr.mxu1 %v825_v15 }
  0xbb   : > { %490 = vmatprep.mubr.f32.mxu0 %v1692_v5  ;;  %624 = vmatmul.mubr.f32.gmra.mxu1 %v364_v1 }
  0xbc   : > { %629 = vmatprep.mubr.f32.mxu1 %v1692_v5 }
  0xbe   : > { %491 = vmatmul.mubr.f32.gmra.mxu0 %v366_v7 }
  0xbf   : > { %496 = vmatprep.mubr.f32.mxu0 %v1692_v5  ;;  %630 = vmatmul.mubr.f32.gmra.mxu1 %v365_v6 }
  0xc0   : > { %635 = vmatprep.mubr.f32.mxu1 %v1692_v5 }
  0xc2   : > { %497 = vmatmul.mubr.f32.gmra.mxu0 %v367_v8 }
  0xc3   : > { %502 = vmatprep.mubr.f32.mxu0 %v1692_v5  ;;  %636 = vmatmul.mubr.f32.gmra.mxu1 %v366_v7 }
  0xc4   : > { %641 = vmatprep.mubr.f32.mxu1 %v1692_v5 }
  0xc6   : > { %503 = vmatmul.mubr.f32.gmra.mxu0 %v368_v9 }
  0xc7   : > { %508 = vmatprep.mubr.f32.mxu0 %v1692_v5  ;;  %642 = vmatmul.mubr.f32.gmra.mxu1 %v367_v8 }
  0xc8   : > { %647 = vmatprep.mubr.f32.mxu1 %v1692_v5 }
  0xca   : > { %509 = vmatmul.mubr.f32.gmra.mxu0 %v369_v10 }
  0xcb   : > { %648 = vmatmul.mubr.f32.gmra.mxu1 %v368_v9 }
  0xcc   : > { %653 = vmatprep.mubr.f32.mxu1 %v1692_v5  ;;  %v809_v5 = vld [vmem:[%s1962_s27 + $0x68] sm:$0xff] }
  0xcd   : > { %1167 = vmatpush3.msra.mxu0 %v809_v5  ;;  %1236 = vmatpush3.msra.mxu1 %v809_v5 }
  0xce   : > { %1168 = vmatprep.subr.mxu0 %v824_v16  ;;  %1221 = vmatprep.subr.mxu1 %v824_v16 }
  0xcf   : > { %654 = vmatmul.mubr.f32.gmra.mxu1 %v369_v10  ;;  %1169 = vmatpush3.msra.mxu0 %v808_v17 }
  0xd0   : > { %1237 = vmatpush3.msra.mxu1 %v808_v17  ;;  %1170 = vmatprep.subr.mxu0 %v823_v18 }
  0xd1   : > { %1222 = vmatprep.subr.mxu1 %v823_v18  ;;  %1171 = vmatpush3.msra.mxu0 %v807_v19 }
  0xd2   : > { %1238 = vmatpush3.msra.mxu1 %v807_v19  ;;  %1172 = vmatprep.subr.mxu0 %v822_v20 }
  0xd3   : > { %1223 = vmatprep.subr.mxu1 %v822_v20  ;;  %1173 = vmatpush3.msra.mxu0 %v806_v21 }
  0xd4   : > { %1239 = vmatpush3.msra.mxu1 %v806_v21  ;;  %1174 = vmatprep.subr.mxu0 %v821_v22 }
  0xd5   : > { %1224 = vmatprep.subr.mxu1 %v821_v22  ;;  %1175 = vmatpush3.msra.mxu0 %v805_v23 }
  0xd6   : > { %1240 = vmatpush3.msra.mxu1 %v805_v23  ;;  %1176 = vmatprep.subr.mxu0 %v820_v24 }
  0xd7   : > { %1225 = vmatprep.subr.mxu1 %v820_v24  ;;  %1177 = vmatpush3.msra.mxu0 %v804_v25 }
  0xd8   : > { %1241 = vmatpush3.msra.mxu1 %v804_v25  ;;  %1178 = vmatprep.subr.mxu0 %v819_v26 }
  0xd9   : > { %1226 = vmatprep.subr.mxu1 %v819_v26  ;;  %1179 = vmatpush3.msra.mxu0 %v803_v27 }
  0xda   : > { %1242 = vmatpush3.msra.mxu1 %v803_v27  ;;  %1180 = vmatprep.subr.mxu0 %v818_v28 }
  0xdb   : > { %1227 = vmatprep.subr.mxu1 %v818_v28  ;;  %1181 = vmatpush3.msra.mxu0 %v802_v29 }
  0xdc   : > { %1243 = vmatpush3.msra.mxu1 %v802_v29  ;;  %1182 = vmatprep.subr.mxu0 %v817_v30 }
  0xdd   : > { %1228 = vmatprep.subr.mxu1 %v817_v30  ;;  %1183 = vmatpush3.msra.mxu0 %v801_v31 }
  0xde   : > { %1244 = vmatpush3.msra.mxu1 %v801_v31  ;;  %1184 = vmatprep.subr.mxu0 %v816_v32 }
  0xdf   : > { %1229 = vmatprep.subr.mxu1 %v816_v32  ;;  %1185 = vmatpush3.msra.mxu0 %v800_v33 }
  0xe0   : > { %1245 = vmatpush3.msra.mxu1 %v800_v33  ;;  %1186 = vmatprep.subr.mxu0 %v815_v34 }
  0xe1   : > { %1230 = vmatprep.subr.mxu1 %v815_v34  ;;  %1187 = vmatpush3.msra.mxu0 %v799_v35 }
  0xe2   : > { %1246 = vmatpush3.msra.mxu1 %v799_v35  ;;  %1188 = vmatprep.subr.mxu0 %v814_v36 }
  0xe3   : > { %1231 = vmatprep.subr.mxu1 %v814_v36  ;;  %1189 = vmatpush3.msra.mxu0 %v798_v37 }
  0xe4   : > { %1247 = vmatpush3.msra.mxu1 %v798_v37  ;;  %1190 = vmatprep.subr.mxu0 %v813_v38 }
  0xe5   : > { %1232 = vmatprep.subr.mxu1 %v813_v38  ;;  %1191 = vmatpush3.msra.mxu0 %v797_v39 }
  0xe6   : > { %1248 = vmatpush3.msra.mxu1 %v797_v39  ;;  %1192 = vmatprep.subr.mxu0 %v812_v40 }
  0xe7   : > { %1233 = vmatprep.subr.mxu1 %v812_v40  ;;  %1193 = vmatpush3.msra.mxu0 %v796_v41 }
  0xe8   : > { %1249 = vmatpush3.msra.mxu1 %v796_v41 }
 0x16e   : > { %v2099_v42 = vpop.f32.mrf.mxu0 }
 0x16f   : > { %v1136_v43 = vmul.f32 -1.442695, %v2099_v42 }
 0x170   : > { %v2102_v44 = vpop.f32.mrf.mxu0 }
 0x171   : > { %1376 = vpow2.f32 %v1136_v43  ;;  %v1137_v45 = vmul.f32 -1.442695, %v2102_v44 }
 0x172   : > { %v2105_v46 = vpop.f32.mrf.mxu0 }
 0x173   : > { %1378 = vpow2.f32 %v1137_v45  ;;  %v1138_v47 = vmul.f32 -1.442695, %v2105_v46  ;;  %v2117_v54 = vpop.f32.mrf.mxu1 }
 0x174   : > { %v2108_v48 = vpop.f32.mrf.mxu0 }
 0x175   : > { %1380 = vpow2.f32 %v1138_v47  ;;  %v1139_v49 = vmul.f32 -1.442695, %v2108_v48  ;;  %v2122_v57 = vpop.f32.mrf.mxu1 }
 0x176   : > { %v2111_v50 = vpop.f32.mrf.mxu0 }
 0x177   : > { %1382 = vpow2.f32 %v1139_v49  ;;  %v1140_v51 = vmul.f32 -1.442695, %v2111_v50  ;;  %v2127_v60 = vpop.f32.mrf.mxu1 }
 0x178   : > { %v2114_v52 = vpop.f32.mrf.mxu0 }
 0x179   : > { %1384 = vpow2.f32 %v1140_v51  ;;  %v1141_v53 = vmul.f32 -1.442695, %v2114_v52  ;;  %v2132_v1 = vpop.f32.mrf.mxu1 }
 0x17a   : > { %v2119_v55 = vpop.f32.mrf.mxu0 }
 0x17b   : > { %1386 = vpow2.f32 %v1141_v53  ;;  %v1142_v56 = vmul.f32 -1.442695, %v2119_v55  ;;  %v2140_v11 = vpop.f32.mrf.mxu1 }
 0x17c   : > { %v2124_v58 = vpop.f32.mrf.mxu0 }
 0x17d   : > { %1388 = vpow2.f32 %v1142_v56  ;;  %v1143_v59 = vmul.f32 -1.442695, %v2124_v58  ;;  %v2148_v19 = vpop.f32.mrf.mxu1 }
 0x17e   : > { %v1377_v61 = vpop.eup %1376  ;;  %v2129_v62 = vpop.f32.mrf.mxu0 }
 0x17f   : > { %v708_v63 = vadd.f32 1.0, %v1377_v61  ;;  %1390 = vpow2.f32 %v1143_v59  ;;  %v1144_v0 = vmul.f32 -1.442695, %v2129_v62  ;;  %v2156_v28 = vpop.f32.mrf.mxu1 }
 0x180   : > { %v1379_v2 = vpop.eup %1378  ;;  %v2134_v3 = vpop.f32.mrf.mxu0 }
 0x181   : > { %1392 = vrcp.f32 %v708_v63  ;;  %v709_v4 = vadd.f32 1.0, %v1379_v2  ;;  %v1145_v6 = vmul.f32 -1.442695, %v2134_v3  ;;  %v633_v35 = vpop.f32.mrf.mxu1 }
 0x182   : > { %v1381_v7 = vpop.eup %1380  ;;  %1394 = vpow2.f32 %v1144_v0  ;;  %v2137_v8 = vpop.f32.mrf.mxu0 }
 0x183   : > { %1396 = vrcp.f32 %v709_v4  ;;  %v710_v9 = vadd.f32 1.0, %v1381_v7  ;;  %v1146_v10 = vmul.f32 -1.442695, %v2137_v8  ;;  %v637_v49 = vpop.f32.mrf.mxu1 }
 0x184   : > { %v1383_v12 = vpop.eup %1382  ;;  %1398 = vpow2.f32 %v1145_v6  ;;  %v2142_v13 = vpop.f32.mrf.mxu0 }
 0x185   : > { %1400 = vrcp.f32 %v710_v9  ;;  %v711_v14 = vadd.f32 1.0, %v1383_v12  ;;  %v1147_v15 = vmul.f32 -1.442695, %v2142_v13 }
 0x186   : > { %v1385_v5 = vpop.eup %1384  ;;  %1402 = vpow2.f32 %v1146_v10  ;;  %v2145_v16 = vpop.f32.mrf.mxu0 }
 0x187   : > { %1404 = vrcp.f32 %v711_v14  ;;  %v712_v17 = vadd.f32 1.0, %v1385_v5  ;;  %v1148_v18 = vmul.f32 -1.442695, %v2145_v16 }
 0x188   : > { %v1387_v20 = vpop.eup %1386  ;;  %1406 = vpow2.f32 %v1147_v15  ;;  %v2150_v21 = vpop.f32.mrf.mxu0 }
 0x189   : > { %1408 = vrcp.f32 %v712_v17  ;;  %v713_v22 = vadd.f32 1.0, %v1387_v20  ;;  %v1149_v23 = vmul.f32 -1.442695, %v2150_v21 }
 0x18a   : > { %v1389_v24 = vpop.eup %1388  ;;  %1410 = vpow2.f32 %v1148_v18  ;;  %v2153_v25 = vpop.f32.mrf.mxu0 }
 0x18b   : > { %1412 = vrcp.f32 %v713_v22  ;;  %v714_v26 = vadd.f32 1.0, %v1389_v24  ;;  %v1150_v27 = vmul.f32 -1.442695, %v2153_v25 }
 0x18c   : > { %v1391_v29 = vpop.eup %1390  ;;  %1414 = vpow2.f32 %v1149_v23  ;;  %v2158_v30 = vpop.f32.mrf.mxu0 }
 0x18d   : > { %1416 = vrcp.f32 %v714_v26  ;;  %v715_v31 = vadd.f32 1.0, %v1391_v29  ;;  %v1151_v32 = vmul.f32 -1.442695, %v2158_v30 }
 0x18e   : > { %v1393_v33 = vpop.eup %1392  ;;  %1418 = vpow2.f32 %v1150_v27 }
 0x18f   : > { %v1395_v34 = vpop.eup %1394  ;;  %1420 = vrcp.f32 %v715_v31  ;;  %v756_v37 = vmul.f32 %v1393_v33, %v2099_v42 }
 0x190   : > { %v1397_v36 = vpop.eup %1396  ;;  %v716_v38 = vadd.f32 1.0, %v1395_v34  ;;  %1422 = vpow2.f32 %v1151_v32 }
 0x191   : > { %v1399_v39 = vpop.eup %1398  ;;  %v757_v40 = vmul.f32 %v1397_v36, %v2102_v44  ;;  %v772_v59 = vmul.f32 %v756_v37, %v2117_v54 }
 0x192   : > { %v1401_v41 = vpop.eup %1400  ;;  %1424 = vrcp.f32 %v716_v38  ;;  %v717_v43 = vadd.f32 1.0, %v1399_v39 }
 0x193   : > { %v1403_v45 = vpop.eup %1402  ;;  %v773_v47 = vmul.f32 %v757_v40, %v2122_v57  ;;  %v758_v53 = vmul.f32 %v1401_v41, %v2105_v46  ;;  %v639_v57 = vpop.f32.mrf.mxu1 }
 0x194   : > { %v1405_v51 = vpop.eup %1404  ;;  %1426 = vrcp.f32 %v717_v43  ;;  %v718_v56 = vadd.f32 1.0, %v1403_v45 }
 0x195   : > { %v1407_v42 = vpop.eup %1406  ;;  %v759_v61 = vmul.f32 %v1405_v51, %v2108_v48  ;;  %892 = vmatprep.mubr.f32.mxu0 %v773_v47  ;;  %v774_v7 = vmul.f32 %v758_v53, %v2127_v60 }
 0x196   : > { %v1409_v63 = vpop.eup %1408  ;;  %1428 = vrcp.f32 %v718_v56  ;;  %v719_v44 = vadd.f32 1.0, %v1407_v42  ;;  %893 = vmatmul.mubr.f32.vlgmr.msra.gmra.mxu0 %v772_v59  ;;  %v789_v59 = vld [vmem:[%s1968_s29 + $0x8] sm:$0xff] }
 0x197   : > { %v1411_v0 = vpop.eup %1410  ;;  %v775_v2 = vmul.f32 %v759_v61, %v2132_v1  ;;  %v760_v6 = vmul.f32 %v1409_v63, %v2111_v50  ;;  %v643_v1 = vpop.f32.mrf.mxu1 }
 0x198   : > { %v1413_v4 = vpop.eup %1412  ;;  %1430 = vrcp.f32 %v719_v44  ;;  %v720_v46 = vadd.f32 1.0, %v1411_v0  ;;  %v790_v44 = vld [vmem:[%s1968_s29 + $0x10] sm:$0xff] }
 0x199   : > { %v1415_v54 = vpop.eup %1414  ;;  %v761_v9 = vmul.f32 %v1413_v4, %v2114_v52  ;;  %897 = vmatprep.mubr.f32.mxu0 %v775_v2  ;;  %v776_v17 = vmul.f32 %v760_v6, %v2140_v11  ;;  %v645_v23 = vpop.f32.mrf.mxu1  ;;  %v791_v6 = vld [vmem:[%s1968_s29 + $0x18] sm:$0xff] }
 0x19a   : > { %v1417_v48 = vpop.eup %1416  ;;  %1432 = vrcp.f32 %v720_v46  ;;  %v721_v10 = vadd.f32 1.0, %v1415_v54  ;;  %898 = vmatmul.mubr.f32.gmra.mxu0 %v774_v7 }
 0x19b   : > { %v1419_v12 = vpop.eup %1418  ;;  %v777_v14 = vmul.f32 %v761_v9, %v2148_v19  ;;  %v762_v5 = vmul.f32 %v1417_v48, %v2119_v55  ;;  %v649_v27 = vpop.f32.mrf.mxu1  ;;  %v792_v48 = vld [vmem:[%s1968_s29 + $0x20] sm:$0xff] }
 0x19c   : > { %v1421_v15 = vpop.eup %1420  ;;  %1434 = vrcp.f32 %v721_v10  ;;  %v722_v50 = vadd.f32 1.0, %v1419_v12 }
 0x19d   : > { %v1423_v60 = vpop.eup %1422  ;;  %v763_v18 = vmul.f32 %v1421_v15, %v2124_v58  ;;  %902 = vmatprep.mubr.f32.mxu0 %v777_v14  ;;  %v778_v19 = vmul.f32 %v762_v5, %v2156_v28  ;;  %v651_v28 = vpop.f32.mrf.mxu1  ;;  %v793_v15 = vld [vmem:[%s1968_s29 + $0x28] sm:$0xff] }
 0x19e   : > { %1436 = vrcp.f32 %v722_v50  ;;  %v723_v52 = vadd.f32 1.0, %v1423_v60  ;;  %903 = vmatmul.mubr.f32.gmra.mxu0 %v776_v17 }
 0x19f   : > { %v1425_v20 = vpop.eup %1424  ;;  %v779_v22 = vmul.f32 %v763_v18, %v633_v35  ;;  %v655_v39 = vpop.f32.mrf.mxu1  ;;  %v794_v18 = vld [vmem:[%s1968_s29 + $0x30] sm:$0xff] }
 0x1a0   : > { %1438 = vrcp.f32 %v723_v52  ;;  %v764_v55 = vmul.f32 %v1425_v20, %v2129_v62 }
 0x1a1   : > { %v1427_v24 = vpop.eup %1426  ;;  %907 = vmatprep.mubr.f32.mxu0 %v779_v22  ;;  %v657_v45 = vpop.f32.mrf.mxu1 }
 0x1a2   : > { %v765_v26 = vmul.f32 %v1427_v24, %v2134_v3  ;;  %908 = vmatmul.mubr.f32.gmra.mxu0 %v778_v19  ;;  %v780_v32 = vmul.f32 %v764_v55, %v637_v49  ;;  %v788_v49 = vld [vmem:[%s1968_s29] sm:$0xff]  ;;  %v795_v19 = vld [vmem:[%s1968_s29 + $0x38] sm:$0xff] }
 0x1a3   : > { %v1429_v11 = vpop.eup %1428 }
 0x1a4   : > { %v781_v58 = vmul.f32 %v765_v26, %v639_v57  ;;  %v766_v31 = vmul.f32 %v1429_v11, %v2137_v8 }
 0x1a5   : > { %v1431_v29 = vpop.eup %1430 }
 0x1a6   : > { %v767_v33 = vmul.f32 %v1431_v29, %v2142_v13  ;;  %912 = vmatprep.mubr.f32.mxu1 %v781_v58  ;;  %v782_v37 = vmul.f32 %v766_v31, %v643_v1 }
 0x1a7   : > { %v1433_v34 = vpop.eup %1432  ;;  %913 = vmatmul.mubr.f32.vlgmr.msra.gmra.mxu1 %v780_v32 }
 0x1a8   : > { %v783_v35 = vmul.f32 %v767_v33, %v645_v23  ;;  %v768_v62 = vmul.f32 %v1433_v34, %v2145_v16 }
 0x1a9   : > { %v1435_v36 = vpop.eup %1434 }
 0x1aa   : > { %v769_v3 = vmul.f32 %v1435_v36, %v2150_v21  ;;  %917 = vmatprep.mubr.f32.mxu1 %v783_v35  ;;  %v784_v41 = vmul.f32 %v768_v62, %v649_v27 }
 0x1ab   : > { %v1437_v38 = vpop.eup %1436  ;;  %918 = vmatmul.mubr.f32.gmra.mxu1 %v782_v37 }
 0x1ac   : > { %v785_v8 = vmul.f32 %v769_v3, %v651_v28  ;;  %v770_v13 = vmul.f32 %v1437_v38, %v2153_v25 }
 0x1ad   : > { %v1439_v40 = vpop.eup %1438 }
 0x1ae   : > { %v771_v43 = vmul.f32 %v1439_v40, %v2158_v30  ;;  %922 = vmatprep.mubr.f32.mxu1 %v785_v8  ;;  %v786_v21 = vmul.f32 %v770_v13, %v655_v39 }
 0x1af   : > { %923 = vmatmul.mubr.f32.gmra.mxu1 %v784_v41 }
 0x1b0   : > { %v787_v16 = vmul.f32 %v771_v43, %v657_v45 }
 0x1b2   : > { %927 = vmatprep.mubr.f32.mxu1 %v787_v16 }
 0x1b3   : > { %928 = vmatmul.mubr.f32.gmra.mxu1 %v786_v21 }
 0x256   : > { %v1194_v47 = vpop.f32.mrf.mxu0 }
 0x258   : > { %v1195_v51 = vpop.f32.mrf.mxu0 }
 0x259   : > { %v1196_v53 = vadd.f32 %v1195_v51, %v1194_v47 }
 0x25a   : > { %v1197_v25 = vpop.f32.mrf.mxu0 }
 0x25b   : > { %v933_v56 = vadd.f32 %v1196_v53, %v788_v49 }
 0x25c   : > { %v1198_v30 = vpop.f32.mrf.mxu0 }
 0x25d   : > { %941 = vst [vmem:[%s1968_s29] sm:$0xff] %v933_v56  ;;  %v1199_v42 = vadd.f32 %v1198_v30, %v1197_v25 }
 0x25e   : > { %v1200_v61 = vpop.f32.mrf.mxu0 }
 0x25f   : > { %v934_v63 = vadd.f32 %v1199_v42, %v789_v59 }
 0x260   : > { %v1201_v0 = vpop.f32.mrf.mxu0 }
 0x261   : > { %942 = vst [vmem:[%s1968_s29 + $0x8] sm:$0xff] %v934_v63  ;;  %v1202_v2 = vadd.f32 %v1201_v0, %v1200_v61 }
 0x262   : > { %v1203_v57 = vpop.f32.mrf.mxu0 }
 0x263   : > { %v935_v4 = vadd.f32 %v1202_v2, %v790_v44 }
 0x264   : > { %v1204_v46 = vpop.f32.mrf.mxu0 }
 0x265   : > { %943 = vst [vmem:[%s1968_s29 + $0x10] sm:$0xff] %v935_v4  ;;  %v1205_v7 = vadd.f32 %v1204_v46, %v1203_v57 }
 0x267   : > { %v936_v54 = vadd.f32 %v1205_v7, %v791_v6  ;;  %v1206_v9 = vpop.f32.mrf.mxu1 }
 0x269   : > { %944 = vst [vmem:[%s1968_s29 + $0x18] sm:$0xff] %v936_v54  ;;  %v1207_v10 = vpop.f32.mrf.mxu1 }
 0x26a   : > { %v1208_v12 = vadd.f32 %v1207_v10, %v1206_v9 }
 0x26b   : > { %v1209_v14 = vpop.f32.mrf.mxu1 }
 0x26c   : > { %v937_v1 = vadd.f32 %v1208_v12, %v792_v48 }
 0x26d   : > { %v1210_v5 = vpop.f32.mrf.mxu1 }
 0x26e   : > { %945 = vst [vmem:[%s1968_s29 + $0x20] sm:$0xff] %v937_v1  ;;  %v1211_v50 = vadd.f32 %v1210_v5, %v1209_v14 }
 0x26f   : > { %v1212_v17 = vpop.f32.mrf.mxu1 }
 0x270   : > { %v938_v60 = vadd.f32 %v1211_v50, %v793_v15 }
 0x271   : > { %v1213_v52 = vpop.f32.mrf.mxu1 }
 0x272   : > { %946 = vst [vmem:[%s1968_s29 + $0x28] sm:$0xff] %v938_v60  ;;  %v1214_v20 = vadd.f32 %v1213_v52, %v1212_v17 }
 0x273   : > { %v1215_v22 = vpop.f32.mrf.mxu1 }
 0x274   : > { %v939_v23 = vadd.f32 %v1214_v20, %v794_v18 }
 0x275   : > { %v1216_v24 = vpop.f32.mrf.mxu1 }
 0x276   : > { %947 = vst [vmem:[%s1968_s29 + $0x30] sm:$0xff] %v939_v23  ;;  %v1217_v55 = vadd.f32 %v1216_v24, %v1215_v22 }
 0x278   : > { %v940_v26 = vadd.f32 %v1217_v55, %v795_v19 }
 0x27a   : > { %948 = vst [vmem:[%s1968_s29 + $0x38] sm:$0xff] %v940_v26 }
 0x27b   : > { %1565 = shalt.err (!%p1562_p3)
}
 0x27c   : > { %s1566_s14 = scalar_lea.hbm %s2204_s4, 1024  ;;  %s1570_s30 = scalar_lea.hbm %s2329_s8, 2048 }
 0x27d   : > { %p1567_p5 = scmp.ne.s32.totalorder %s2204_s4, %s1566_s14  ;;  %p1571_p13 = scmp.lt.s32.totalorder %s2204_s4, %s2329_s8 }
 0x27e   : > { %p1572_p4 = scmp.lt.s32.totalorder %s1570_s30, %s1566_s14 }
 0x27f   : > { %p1568_p12 = pnand %p1567_p5, %p2330_p1 }
 0x280   : > { %p1573_p7 = por %p1572_p4, %p1571_p13 }
 0x281   : > { %p1569_p8 = pneg %p1568_p12 }
 0x283   : > { %p1574_p10 = pnand %p1573_p7, %p1569_p8 }
 0x285   : > { %1577 = shalt.err (!%p1574_p10)
}
 0x286   : > { %s1694_s1 = smov 128   ;;  %s1695_s27 = smov 8  }
 0x287   : > { %1258 = dma.vmem_to_hbm [thread:$0]  (%p2330_p1), %s2206_s13, 1024, %s2204_s4, %s950_s26, %s1694_s1, %s1694_s1, %s1695_s27  }
 0x288 PF: > { %p1278_p6 = scmp.ge.s32.totalorder %s1680_s25, 2  ;;  %s978_s29 = sand.u32 1, %s1652_s18  }
 0x289   : > { %p2331_p0 = scmp.ne.s32.totalorder %s2314_s6, 0  ;;  %s979_s10 = scalar_lea.sflag [#allocation4], %s978_s29 }
 0x28b   : > { %p1274_p9 = pnand %p1278_p6, %p2331_p0 }
 0x28d   : > { %p1275_p11 = pneg %p1274_p9 }
 0x28f   : > { %1635 = dma.done.wait (%p1275_p11), %s979_s10, 1024  }
 0x290   : > { %1637 = vsyncadd (%p1275_p11), %s979_s10, 4294966272  ;;  %s26_s25 = sadd.s32 1, %s1680_s25   ;;  %s2332_s12 = sld [smem:[#allocation21_spill]] }
 0x291   : > { %p23_p2 = scmp.ge.s32.totalorder %s26_s25, 6   ;;  %s2333_s7 = sld [smem:[#allocation15_spill]] }
 0x292   : > { %s2334_s20 = sld [smem:[#allocation24_spill]]  ;;  %s2339_s15 = smov %s1644_s16 }
 0x293   : > { %s2335_s21 = sld [smem:[#allocation18_spill]]  ;;  %s2340_s16 = smov %s1648_s17 }
 0x294   : > { %s2336_s22 = sld [smem:[#allocation19_spill]]  ;;  %s2342_s18 = smov %s1656_s19 }
 0x295   : > { %s2337_s23 = sld [smem:[#allocation20_spill]]  ;;  %25 = sbr.rel (!%p23_p2) target bundleno = 18 (0x12), region = 122 }
 0x296   : > { %s2338_s24 = sld [smem:[#allocation22_spill]]  ;;  %s2341_s17 = smov %s2332_s12 }
 0x297   : > { %s2343_s19 = smov %s2333_s7 }
 0x29a   :  { %984 = vsyncpa [#allocation3], 1 }
 0x29b   :  { %986 = vsyncpa [#allocation3 + $0x1], 1 }
 0x29c   :  { %987 = vsyncpa [#allocation6], 1 }
 0x29d   :  { %989 = vsyncpa [#allocation6 + $0x1], 1 }
 0x29e   :  { %990 = vsyncpa [#allocation9], 1 }
 0x29f   :  { %992 = vsyncpa [#allocation9 + $0x1], 1 }
 0x2a0   :  { %993 = vsyncpa [#allocation4], 1 }
 0x2a1   :  { %995 = vsyncpa [#allocation4 + $0x1], 1 }

</bundles_post_ra>
